<compile_context>
chip_gen: v5e
topology: v5e:2x2
jax: 0.10.0
libtpu: 0.0.40
codegen_flags: <defaults>
</compile_context>

<pallas_src>
import functools

import jax
import jax.numpy as jnp
from jax.experimental import pallas as pl
from jax.experimental.pallas import tpu as pltpu

EPS = 1e-5  # torch.nn.BatchNorm2d default
_MIB = 1024 * 1024


@functools.lru_cache(maxsize=None)
def _vmem_policy():
    """Return (block_budget_bytes, vmem_limit_bytes), TPU-generation aware."""
    block, limit = 4 * _MIB, 48 * _MIB  # safe default (fits v7x 64 MiB/TC)
    kind = ""
    try:
        kind = jax.devices()[0].device_kind.lower()
    except Exception:
        pass
    vmem = None
    try:
        vmem = getattr(pltpu.get_tpu_info(), "vmem_capacity_bytes", None)
    except Exception:
        vmem = None
    if "v5" in kind:
        block, limit = 4 * _MIB, 56 * _MIB      # >=95% of v5e HBM roofline
    elif "v6" in kind or (vmem is not None and vmem >= 100 * _MIB):
        block, limit = 8 * _MIB, 96 * _MIB      # 128 MiB physical VMEM
    return block, limit


def _sublane_multiple(itemsize):
    # dtype-packed sublane multiple: f32 -> 8, bf16 -> 16, int8/fp8 -> 32.
    return max(8, 32 // int(itemsize))


def _pick_fused_tc(n, c, hw, itemsize, budget_bytes):
    """Channel tile for the fused path, or None if it cannot fit the budget."""
    sub = _sublane_multiple(itemsize)
    per_channel = n * hw * itemsize
    min_tc = c if c < sub else sub
    if min_tc * per_channel > budget_bytes:
        return None                      # full (N, TC, HW) slab too big -> chunked
    cap = int(budget_bytes // per_channel)
    if cap >= c:
        tc = c
        # Ensure >=2 channel blocks when possible so both v7x TensorCores get
        # work (harmless pipelining split on single-core chips).
        if c >= 2 * sub:
            half = (c + 1) // 2
            tc = min(c, ((half + sub - 1) // sub) * sub)
    else:
        tc = max(min_tc, (cap // sub) * sub)
    return tc


def _pick_chunk_tiles(n, c, hw, itemsize, budget_bytes):
    """(TN, TC, THW) tiles for the chunked (stats + normalize) path."""
    sub = _sublane_multiple(itemsize)
    budget_elems = max(sub * 128, int(budget_bytes // itemsize))
    tc = c if c < sub else sub
    if tc * hw <= budget_elems:
        thw = hw                                    # full lane extent (legal)
    else:
        thw = ((budget_elems // tc) // 128) * 128   # lane chunk, x128
        thw = min(hw, max(thw, 128))
    tn = max(1, min(n, budget_elems // (tc * thw)))
    if 1 < tn < n:
        tn = 1 << (tn.bit_length() - 1)             # fewer ragged N blocks
    room_c = budget_elems // (tn * thw)
    if room_c > tc and c > tc:
        grown = (room_c // sub) * sub
        if grown >= sub:
            tc = min(c, grown)
    return tn, tc, thw


# ---------------------------------------------------------------------------
# Fused path: one grid step owns a full (N, TC, HW) channel slab.
# ---------------------------------------------------------------------------
def _bn_fused_kernel(x_ref, gamma_ref, beta_ref, o_ref):
    x = x_ref[...].astype(jnp.float32)                     # (N, TC, HW)
    n, _, hw = x.shape
    inv_m = jnp.float32(1.0 / (n * hw))

    # Reduce over N first (VALU adds), then one cross-lane (XLU) reduce.
    s0 = jnp.sum(x, axis=0, keepdims=True)                 # (1, TC, HW)
    q0 = jnp.sum(x * x, axis=0, keepdims=True)             # (1, TC, HW)
    mean = jnp.sum(s0, axis=2, keepdims=True) * inv_m      # (1, TC, 1)
    msq = jnp.sum(q0, axis=2, keepdims=True) * inv_m       # (1, TC, 1)
    var = jnp.maximum(msq - mean * mean, jnp.float32(0.0))

    inv_std = jax.lax.rsqrt(var + jnp.float32(EPS))        # EUP
    scale = gamma_ref[...] * inv_std                       # (1, TC, 1)
    shift = beta_ref[...] - mean * scale                   # fold mean into shift
    o_ref[...] = (x * scale + shift).astype(o_ref.dtype)


# ---------------------------------------------------------------------------
# Chunked path, pass 1: per-channel sum / sumsq accumulated over N/HW chunks.
# ---------------------------------------------------------------------------
def _bn_stats_kernel(x_ref, sum_ref, sq_ref, *, tn, thw, n_total, hw_total,
                     ragged_n, ragged_hw):
    ni = pl.program_id(1)
    hi = pl.program_id(2)

    @pl.when((ni == 0) & (hi == 0))
    def _():
        sum_ref[...] = jnp.zeros_like(sum_ref)
        sq_ref[...] = jnp.zeros_like(sq_ref)

    x = x_ref[...].astype(jnp.float32)                     # (TN, TC, THW)
    if ragged_n or ragged_hw:
        valid = None
        if ragged_n:
            rows = jax.lax.broadcasted_iota(jnp.int32, x.shape, 0) + ni * tn
            valid = rows < n_total
        if ragged_hw:
            cols = jax.lax.broadcasted_iota(jnp.int32, x.shape, 2) + hi * thw
            m = cols < hw_total
            valid = m if valid is None else jnp.logical_and(valid, m)
        x = jnp.where(valid, x, jnp.float32(0.0))

    s0 = jnp.sum(x, axis=0)                                # (TC, THW) VALU
    q0 = jnp.sum(x * x, axis=0)                            # (TC, THW) VALU
    sum_ref[...] += jnp.sum(s0, axis=-1, keepdims=True)    # (TC, 1)  XLU
    sq_ref[...] += jnp.sum(q0, axis=-1, keepdims=True)     # (TC, 1)  XLU


# ---------------------------------------------------------------------------
# Chunked path, pass 2: y = x * scale + shift (scale/shift folded per channel).
# ---------------------------------------------------------------------------
def _bn_norm_kernel(x_ref, scale_ref, shift_ref, o_ref):
    x = x_ref[...].astype(jnp.float32)
    o_ref[...] = (x * scale_ref[...] + shift_ref[...]).astype(o_ref.dtype)


@functools.partial(jax.jit, static_argnames=("block_budget_bytes",))
def _batchnorm2d_pallas(x_nchw, gamma, beta, *, block_budget_bytes=None):
    """Training-mode BatchNorm2d forward. x_nchw: (N, C, H, W)."""
    n, c, h, w = x_nchw.shape
    hw = h * w
    dtype = x_nchw.dtype
    itemsize = jnp.dtype(dtype).itemsize

    budget, vmem_limit = _vmem_policy()
    if block_budget_bytes is not None:
        budget = int(block_budget_bytes)

    x3 = x_nchw.reshape(n, c, hw)            # pure view, no data movement
    g32 = gamma.astype(jnp.float32)
    b32 = beta.astype(jnp.float32)
    total = n * c * hw

    tc_fused = _pick_fused_tc(n, c, hw, itemsize, budget)

    if tc_fused is not None:
        # ------------------------- fused path (2 HBM passes) ----------------
        grid = (pl.cdiv(c, tc_fused),)
        out3 = pl.pallas_call(
            _bn_fused_kernel,
            out_shape=jax.ShapeDtypeStruct((n, c, hw), dtype),
            grid_spec=pltpu.PrefetchScalarGridSpec(
                num_scalar_prefetch=0,
                grid=grid,
                in_specs=[
                    pl.BlockSpec((n, tc_fused, hw), lambda i: (0, i, 0)),
                    pl.BlockSpec((1, tc_fused, 1), lambda i: (0, i, 0)),
                    pl.BlockSpec((1, tc_fused, 1), lambda i: (0, i, 0)),
                ],
                out_specs=pl.BlockSpec((n, tc_fused, hw), lambda i: (0, i, 0)),
            ),
            compiler_params=pltpu.CompilerParams(
                dimension_semantics=("parallel",),
                vmem_limit_bytes=vmem_limit,
            ),
            cost_estimate=pl.CostEstimate(
                flops=7 * total, transcendentals=c,
                bytes_accessed=2 * total * itemsize + 2 * c * 4),
        )(x3, g32.reshape(1, c, 1), b32.reshape(1, c, 1))
        return out3.reshape(n, c, h, w)

    # ----------------------- chunked path (3 HBM passes) --------------------
    tn, tc, thw = _pick_chunk_tiles(n, c, hw, itemsize, budget)
    grid = (pl.cdiv(c, tc), pl.cdiv(n, tn), pl.cdiv(hw, thw))
    ragged_n = (n % tn) != 0
    ragged_hw = (hw % thw) != 0

    stats_kernel = functools.partial(
        _bn_stats_kernel, tn=tn, thw=thw, n_total=n, hw_total=hw,
        ragged_n=ragged_n, ragged_hw=ragged_hw)

    s, q = pl.pallas_call(
        stats_kernel,
        out_shape=(jax.ShapeDtypeStruct((c, 1), jnp.float32),
                   jax.ShapeDtypeStruct((c, 1), jnp.float32)),
        grid_spec=pltpu.PrefetchScalarGridSpec(
            num_scalar_prefetch=0,
            grid=grid,
            in_specs=[
                pl.BlockSpec((tn, tc, thw), lambda ci, ni, hi: (ni, ci, hi)),
            ],
            out_specs=[
                pl.BlockSpec((tc, 1), lambda ci, ni, hi: (ci, 0)),
                pl.BlockSpec((tc, 1), lambda ci, ni, hi: (ci, 0)),
            ],
        ),
        compiler_params=pltpu.CompilerParams(
            dimension_semantics=("parallel", "arbitrary", "arbitrary"),
            vmem_limit_bytes=vmem_limit,
        ),
        cost_estimate=pl.CostEstimate(
            flops=3 * total, transcendentals=0,
            bytes_accessed=total * itemsize + 2 * c * 4),
    )(x3)

    # Tiny per-channel math in plain JAX between the two kernels.
    inv_m = jnp.float32(1.0 / (n * hw))
    mean = s * inv_m                                         # (C, 1)
    var = jnp.maximum(q * inv_m - mean * mean, jnp.float32(0.0))
    inv_std = jax.lax.rsqrt(var + jnp.float32(EPS))
    scale = g32.reshape(c, 1) * inv_std                      # gamma / sqrt(var+eps)
    shift = b32.reshape(c, 1) - mean * scale                 # beta - mean*scale

    out3 = pl.pallas_call(
        _bn_norm_kernel,
        out_shape=jax.ShapeDtypeStruct((n, c, hw), dtype),
        grid_spec=pltpu.PrefetchScalarGridSpec(
            num_scalar_prefetch=0,
            grid=grid,
            in_specs=[
                pl.BlockSpec((tn, tc, thw), lambda ci, ni, hi: (ni, ci, hi)),
                pl.BlockSpec((1, tc, 1), lambda ci, ni, hi: (0, ci, 0)),
                pl.BlockSpec((1, tc, 1), lambda ci, ni, hi: (0, ci, 0)),
            ],
            out_specs=pl.BlockSpec((tn, tc, thw),
                                   lambda ci, ni, hi: (ni, ci, hi)),
        ),
        compiler_params=pltpu.CompilerParams(
            dimension_semantics=("parallel", "parallel", "parallel"),
            vmem_limit_bytes=vmem_limit,
        ),
        cost_estimate=pl.CostEstimate(
            flops=2 * total, transcendentals=0,
            bytes_accessed=2 * total * itemsize + 2 * c * 4),
    )(x3, scale.reshape(1, c, 1), shift.reshape(1, c, 1))

    return out3.reshape(n, c, h, w)


class SwithableBatchNormPallas:
    """JAX/Pallas port of SwithableBatchNorm's forward pass."""

    def __init__(self, num_features, bits_list=None, key=None):
        self.num_features = num_features
        self.bits_list = bits_list
        self.bit_width = -1
        key = jax.random.PRNGKey(0) if key is None else key
        n_bns = len(bits_list) if bits_list is not None else 1
        # Deterministic synthetic parameters (gamma, beta) per BN instance.
        # NOTE: the PyTorch module deepcopies one BN so all copies start
        # identical; here each copy gets its own deterministic params so the
        # switching logic is observable.
        keys = jax.random.split(key, 2 * n_bns)
        self.gammas = [
            1.0 + 0.1 * jax.random.normal(keys[2 * i], (num_features,), jnp.float32)
            for i in range(n_bns)
        ]
        self.betas = [
            0.1 * jax.random.normal(keys[2 * i + 1], (num_features,), jnp.float32)
            for i in range(n_bns)
        ]

    def switch_bn(self, bit_width):
        if self.bits_list is not None:
            self.bit_width = bit_width

    def __call__(self, x_nchw):
        if self.bits_list is not None:
            if self.bit_width not in self.bits_list:
                idx = 0
            else:
                idx = self.bits_list.index(self.bit_width)
        else:
            idx = 0
        return _batchnorm2d_pallas(x_nchw, self.gammas[idx], self.betas[idx])


def _reference_bn(x, gamma, beta):
    mean = jnp.mean(x, axis=(0, 2, 3), keepdims=True)
    var = jnp.mean((x - mean) ** 2, axis=(0, 2, 3), keepdims=True)
    g = gamma.reshape(1, -1, 1, 1)
    b = beta.reshape(1, -1, 1, 1)
    return (x - mean) / jnp.sqrt(var + EPS) * g + b


if __name__ == "__main__":
    # Small shape consistent with the module's NCHW BatchNorm2d input.
    N, C, H, W = 2, 4, 16, 16
    key = jax.random.PRNGKey(0)
    x = jax.random.normal(key, (N, C, H, W), jnp.float32)

    mod = SwithableBatchNormPallas(num_features=C, bits_list=[2, 4, 8])
    mod.switch_bn(4)  # selects index 1

    out = jax.block_until_ready(mod(x))
    ref = _reference_bn(x, mod.gammas[1], mod.betas[1])
    assert out.shape == (N, C, H, W)
    assert jnp.allclose(out, ref, atol=1e-4, rtol=1e-4)

    # Fallback path (bit_width not in list -> idx 0).
    mod.switch_bn(16)
    out0 = jax.block_until_ready(mod(x))
    ref0 = _reference_bn(x, mod.gammas[0], mod.betas[0])
    assert jnp.allclose(out0, ref0, atol=1e-4, rtol=1e-4)

    # Exercise the chunked (stats + normalize) path with a tiny forced budget:
    # C=16 -> grid (2, 2, 1), accumulation over N blocks.
    C2 = 16
    x2 = jax.random.normal(jax.random.PRNGKey(1), (N, C2, H, W), jnp.float32)
    g2 = 1.0 + 0.1 * jax.random.normal(jax.random.PRNGKey(2), (C2,), jnp.float32)
    b2 = 0.1 * jax.random.normal(jax.random.PRNGKey(3), (C2,), jnp.float32)
    out2 = jax.block_until_ready(
        _batchnorm2d_pallas(x2, g2, b2, block_budget_bytes=8192))
    ref2 = _reference_bn(x2, g2, b2)
    assert jnp.allclose(out2, ref2, atol=1e-4, rtol=1e-4)

    # Exercise ragged HW chunking + in-kernel masking: HW=400 split into
    # 256-lane chunks (last chunk ragged), N iterated one sample at a time.
    N3, C3, H3, W3 = 3, 4, 20, 20
    x3 = jax.random.normal(jax.random.PRNGKey(4), (N3, C3, H3, W3), jnp.float32)
    g3 = 1.0 + 0.1 * jax.random.normal(jax.random.PRNGKey(5), (C3,), jnp.float32)
    b3 = 0.1 * jax.random.normal(jax.random.PRNGKey(6), (C3,), jnp.float32)
    out3 = jax.block_until_ready(
        _batchnorm2d_pallas(x3, g3, b3, block_budget_bytes=2048))
    ref3 = _reference_bn(x3, g3, b3)
    assert jnp.allclose(out3, ref3, atol=1e-4, rtol=1e-4)

    print("KERNEL_OK")
</pallas_src>

<mosaic_0001>
module attributes {stable_mosaic.version = 11 : i64} {
  func.func @_bn_fused_kernel(%arg0: i32, %arg1: memref<2x4x256xf32, #tpu.memory_space<vmem>>, %arg2: memref<1x4x1xf32, #tpu.memory_space<vmem>>, %arg3: memref<1x4x1xf32, #tpu.memory_space<vmem>>, %arg4: memref<2x4x256xf32, #tpu.memory_space<vmem>>) attributes {dimension_semantics = [#tpu.dimension_semantics<parallel>], iteration_bounds = array<i64: 1>, scalar_prefetch = 0 : i64, scratch_operands = 0 : i64, tpu.core_type = #tpu.core_type<tc>, window_params = [{transform_indices = @transform_0, window_bounds = array<i64: 2, 4, 256>}, {transform_indices = @transform_1, window_bounds = array<i64: 1, 4, 1>}, {transform_indices = @transform_2, window_bounds = array<i64: 1, 4, 1>}, {transform_indices = @transform_3, window_bounds = array<i64: 2, 4, 256>}]} {
    %c0 = arith.constant 0 : index
    %c0_0 = arith.constant 0 : index
    %c0_1 = arith.constant 0 : index
    %0 = vector.load %arg1[%c0, %c0_0, %c0_1] : memref<2x4x256xf32, #tpu.memory_space<vmem>>, vector<2x4x256xf32>
    %cst = arith.constant dense<0.000000e+00> : vector<4x256xf32>
    %1 = vector.multi_reduction <add>, %0, %cst [0] : vector<2x4x256xf32> to vector<4x256xf32>
    %2 = vector.shape_cast %1 : vector<4x256xf32> to vector<1x4x256xf32>
    %3 = arith.mulf %0, %0 : vector<2x4x256xf32>
    %cst_2 = arith.constant dense<0.000000e+00> : vector<4x256xf32>
    %4 = vector.multi_reduction <add>, %3, %cst_2 [0] : vector<2x4x256xf32> to vector<4x256xf32>
    %5 = vector.shape_cast %4 : vector<4x256xf32> to vector<1x4x256xf32>
    %cst_3 = arith.constant dense<0.000000e+00> : vector<1x4xf32>
    %6 = vector.multi_reduction <add>, %2, %cst_3 [2] : vector<1x4x256xf32> to vector<1x4xf32>
    %7 = vector.shape_cast %6 : vector<1x4xf32> to vector<1x4x1xf32>
    %cst_4 = arith.constant 0.001953125 : f32
    %8 = vector.broadcast %cst_4 : f32 to vector<1x4x1xf32>
    %9 = arith.mulf %7, %8 : vector<1x4x1xf32>
    %cst_5 = arith.constant dense<0.000000e+00> : vector<1x4xf32>
    %10 = vector.multi_reduction <add>, %5, %cst_5 [2] : vector<1x4x256xf32> to vector<1x4xf32>
    %11 = vector.shape_cast %10 : vector<1x4xf32> to vector<1x4x1xf32>
    %cst_6 = arith.constant 0.001953125 : f32
    %12 = vector.broadcast %cst_6 : f32 to vector<1x4x1xf32>
    %13 = arith.mulf %11, %12 : vector<1x4x1xf32>
    %14 = arith.mulf %9, %9 : vector<1x4x1xf32>
    %15 = arith.subf %13, %14 : vector<1x4x1xf32>
    %cst_7 = arith.constant 0.000000e+00 : f32
    %16 = vector.broadcast %cst_7 : f32 to vector<1x4x1xf32>
    %17 = arith.maximumf %15, %16 : vector<1x4x1xf32>
    %cst_8 = arith.constant 9.99999974E-6 : f32
    %18 = vector.broadcast %cst_8 : f32 to vector<1x4x1xf32>
    %19 = arith.addf %17, %18 : vector<1x4x1xf32>
    %20 = math.rsqrt %19 : vector<1x4x1xf32>
    %c0_9 = arith.constant 0 : index
    %c0_10 = arith.constant 0 : index
    %c0_11 = arith.constant 0 : index
    %21 = vector.load %arg2[%c0_9, %c0_10, %c0_11] : memref<1x4x1xf32, #tpu.memory_space<vmem>>, vector<1x4x1xf32>
    %22 = arith.mulf %21, %20 : vector<1x4x1xf32>
    %c0_12 = arith.constant 0 : index
    %c0_13 = arith.constant 0 : index
    %c0_14 = arith.constant 0 : index
    %23 = vector.load %arg3[%c0_12, %c0_13, %c0_14] : memref<1x4x1xf32, #tpu.memory_space<vmem>>, vector<1x4x1xf32>
    %24 = arith.mulf %9, %22 : vector<1x4x1xf32>
    %25 = arith.subf %23, %24 : vector<1x4x1xf32>
    %26 = vector.broadcast %22 : vector<1x4x1xf32> to vector<2x4x256xf32>
    %27 = arith.mulf %0, %26 : vector<2x4x256xf32>
    %28 = vector.broadcast %25 : vector<1x4x1xf32> to vector<2x4x256xf32>
    %29 = arith.addf %27, %28 : vector<2x4x256xf32>
    %c0_15 = arith.constant 0 : index
    %c0_16 = arith.constant 0 : index
    %c0_17 = arith.constant 0 : index
    %30 = vector.load %arg4[%c0_15, %c0_16, %c0_17] : memref<2x4x256xf32, #tpu.memory_space<vmem>>, vector<2x4x256xf32>
    tpu.vector_store %arg4[%c0_15, %c0_16, %c0_17], %29 {strides = array<i32>} : memref<2x4x256xf32, #tpu.memory_space<vmem>>, vector<2x4x256xf32>,
    return
  }
  func.func @transform_0(%arg0: i32) -> (i32, i32, i32) {
    %c0_i32 = arith.constant 0 : i32
    %c0_i32_0 = arith.constant 0 : i32
    %c0_i32_1 = arith.constant 0 : i32
    return %c0_i32, %arg0, %c0_i32_0 : i32, i32, i32
  }
  func.func @transform_1(%arg0: i32) -> (i32, i32, i32) {
    %c0_i32 = arith.constant 0 : i32
    %c0_i32_0 = arith.constant 0 : i32
    %c0_i32_1 = arith.constant 0 : i32
    return %c0_i32, %arg0, %c0_i32_0 : i32, i32, i32
  }
  func.func @transform_2(%arg0: i32) -> (i32, i32, i32) {
    %c0_i32 = arith.constant 0 : i32
    %c0_i32_0 = arith.constant 0 : i32
    %c0_i32_1 = arith.constant 0 : i32
    return %c0_i32, %arg0, %c0_i32_0 : i32, i32, i32
  }
  func.func @transform_3(%arg0: i32) -> (i32, i32, i32) {
    %c0_i32 = arith.constant 0 : i32
    %c0_i32_0 = arith.constant 0 : i32
    %c0_i32_1 = arith.constant 0 : i32
    return %c0_i32, %arg0, %c0_i32_0 : i32, i32, i32
  }
}

</mosaic_0001>

<bundles_post_ra>
// kernel: _batchnorm2d_pallas.1
= control target key start
LH: loop header
LB: loop body
LE: loop exit
PB: predicated region body
PF: predicated region fallthrough
CT: control target
= control target key end

     0   :  { %vm29_vm0 = vcmask 1043456   ;;  %v122_v30 = vmov 0   ;;  %v123_v51 = vmov 839922192   ;;  %s186_s0 = inlined_call_operand.vmem [shape: f32[2,4,256], index: 0, kind: input, shape index: {}]   ;;  %s187_s1 = inlined_call_operand.vmem [shape: f32[1,4,1], index: 1, kind: input, shape index: {}]   ;;  %s188_s2 = inlined_call_operand.vmem [shape: f32[1,4,1], index: 2, kind: input, shape index: {}]   ;;  %s189_s3 = inlined_call_operand.vmem [shape: f32[2,4,256], index: 3, kind: output, shape index: {}]  }
   0x1   :  { %v147_v0 = vld [vmem:[%s186_s0] sm:$0xff]  ;;  %v152_v1 = vld [vmem:[%s186_s0 + $0x8] sm:$0xff]  ;;  %118 = vset.pattern.permute.xlu1 %v122_v30  ;;  %119 = vset.pattern.permute.xlu0 %v122_v30  ;;  %v93_v52 = vunpack.c.l.s4 %v123_v51 }
   0x2   :  { %18 = vst [vmem:[#allocation1] ss:$2 sm:$0xff] %v147_v0  ;;  %v36_v2 = vmul.f32 %v147_v0, %v147_v0  ;;  %v37_v3 = vmul.f32 %v152_v1, %v152_v1  ;;  %v83_v45 = vld [vmem:[%s187_s1] sm:$0xf] }
   0x3   :  { %22 = vst [vmem:[#allocation1 + $0x10] ss:$2 sm:$0xff] %v152_v1  ;;  %v85_v49 = vld [vmem:[%s188_s2] sm:$0xf]  ;;  %v94_v54 = vunpack.c.0.s8 %v93_v52 }
   0x9   :  { %v19_v4 = vld.sshfl [vmem:[#allocation1] sm:$0xff pattern:$0x75316420]  ;;  %v20_v5 = vld.sshfl [vmem:[#allocation1 + $0x8] sm:$0xff pattern:$0x75316420] }
   0xa   :  { %v23_v6 = vld.sshfl [vmem:[#allocation1 + $0x10] sm:$0xff pattern:$0x75316420]  ;;  %v24_v7 = vld.sshfl [vmem:[#allocation1 + $0x18] sm:$0xff pattern:$0x75316420] }
   0xb   :  { %v30_v8 = vsel %vm29_vm0, %v19_v4, 0.0  ;;  %v31_v9 = vsel %vm29_vm0, %v23_v6, 0.0  ;;  %v33_v10 = vsel %vm29_vm0, %v20_v5, 0.0  ;;  %v34_v11 = vsel %vm29_vm0, %v24_v7, 0.0  ;;  %40 = vst [vmem:[#allocation1] ss:$2 sm:$0xff] %v36_v2 }
   0xc   :  { %v32_v12 = vadd.f32 %v31_v9, %v30_v8  ;;  %v35_v13 = vadd.f32 %v34_v11, %v33_v10  ;;  %44 = vst [vmem:[#allocation1 + $0x10] ss:$2 sm:$0xff] %v37_v3 }
   0xe   :  { %v57_v14 = vsel %vm29_vm0, %v32_v12, 0.0  ;;  %v58_v15 = vsel %vm29_vm0, %v35_v13, 0.0 }
   0xf   :  { %v59_v16 = vadd.f32 %v58_v15, %v57_v14 }
  0x11   :  { %60 = vadd.xlane.f32.xlu0 %v59_v16 }
  0x12   :  { %v41_v17 = vld.sshfl [vmem:[#allocation1] sm:$0xff pattern:$0x75316420]  ;;  %v42_v18 = vld.sshfl [vmem:[#allocation1 + $0x8] sm:$0xff pattern:$0x75316420] }
  0x13   :  { %v45_v19 = vld.sshfl [vmem:[#allocation1 + $0x10] sm:$0xff pattern:$0x75316420]  ;;  %v46_v20 = vld.sshfl [vmem:[#allocation1 + $0x18] sm:$0xff pattern:$0x75316420] }
  0x14   :  { %v51_v21 = vsel %vm29_vm0, %v41_v17, 0.0  ;;  %v52_v22 = vsel %vm29_vm0, %v45_v19, 0.0  ;;  %v54_v23 = vsel %vm29_vm0, %v42_v18, 0.0  ;;  %v55_v24 = vsel %vm29_vm0, %v46_v20, 0.0 }
  0x15   :  { %v53_v25 = vadd.f32 %v52_v22, %v51_v21  ;;  %v56_v26 = vadd.f32 %v55_v24, %v54_v23 }
  0x17   :  { %v63_v27 = vsel %vm29_vm0, %v53_v25, 0.0  ;;  %v64_v28 = vsel %vm29_vm0, %v56_v26, 0.0 }
  0x18   :  { %v65_v29 = vadd.f32 %v64_v28, %v63_v27 }
  0x1a   :  { %66 = vadd.xlane.f32.xlu0 %v65_v29 }
  0x84   :  { %v61_v31 = vpop.xlane.xlu0 %60 }
  0x85   :  { %v62_v32 = vmul.f32 0.001953125, %v61_v31 }
  0x87   :  { %v69_v34 = vmul.f32 %v62_v32, %v62_v32 }
  0x8d   :  { %v67_v33 = vpop.xlane.xlu0 %66 }
  0x8e   :  { %v68_v35 = vmul.f32 0.001953125, %v67_v33 }
  0x90   :  { %v70_v36 = vsub.f32 %v68_v35, %v69_v34 }
  0x92   :  { %v71_v37 = vmax.f32 %v70_v36, 0.0 }
  0x94   :  { %v72_v38 = vadd.f32 1e-05, %v71_v37 }
  0x96   :  { %120 = vrsqrt.f32 %v72_v38  ;;  %vm79_vm2 = vweird.f32 %v72_v38 }
  0x9c   :  { %v121_v39 = vpop.eup %120 }
  0x9d   :  { %v74_v40 = vmul.f32 %v121_v39, %v72_v38  ;;  %vm80_vm1 = vweird.f32 %v121_v39 }
  0x9e   :  { %vm81_vm3 = vmor %vm79_vm2, %vm80_vm1 }
  0x9f   :  { %v75_v41 = vmul.f32 %v121_v39, %v74_v40 }
  0xa1   :  { %v76_v42 = vmul.f32 0.5, %v75_v41 }
  0xa3   :  { %v77_v43 = vsub.f32 1.5, %v76_v42 }
  0xa5   :  { %v78_v44 = vmul.f32 %v121_v39, %v77_v43 }
  0xa7   :  { %v82_v46 = vsel %vm81_vm3, %v121_v39, %v78_v44 }
  0xa8   :  { %v84_v47 = vmul.f32 %v83_v45, %v82_v46 }
  0xaa   :  { %90 = vperm.xlu1 %118, %v84_v47   ;;  %v86_v48 = vmul.f32 %v84_v47, %v62_v32 }
  0xac   :  { %v87_v50 = vsub.f32 %v85_v49, %v86_v48 }
  0xb2   :  { %101 = vperm.xlu1 %118, %v87_v50  }
 0x11c   :  { %v91_v53 = vpop.permute.xlu1 %90 }
 0x11d   :  { %v95_v55 = vperm.slane %v91_v53, %v94_v54 }
 0x11f   :  { %v97_v57 = vmul.f32 %v95_v55, %v147_v0  ;;  %v98_v58 = vmul.f32 %v95_v55, %v152_v1 }
 0x124   :  { %v102_v56 = vpop.permute.xlu1 %101 }
 0x125   :  { %v106_v59 = vperm.slane %v102_v56, %v94_v54 }
 0x127   :  { %v108_v60 = vadd.f32 %v106_v59, %v97_v57  ;;  %v109_v61 = vadd.f32 %v106_v59, %v98_v58 }
 0x129   :  { %110 = vst [vmem:[%s189_s3] sm:$0xff] %v108_v60 }
 0x12a   :  { %111 = vst [vmem:[%s189_s3 + $0x8] sm:$0xff] %v109_v61 }

</bundles_post_ra>
